<compile_context>
chip_gen: v6e
topology: v6e:2x2x1
jax: 0.10.0
libtpu: 0.0.40
codegen_flags: <defaults>
</compile_context>

<pallas_src>
import functools

import jax
import jax.numpy as jnp
from jax.experimental import pallas as pl
from jax.experimental.pallas import tpu as pltpu

# Buffer values from ScalingLayer.__init__ (deterministic, no checkpoint).
_SHIFT = (-0.030, -0.088, -0.188)
_SCALE = (0.458, 0.448, 0.450)
_INV_SCALE = tuple(1.0 / s for s in _SCALE)


def _generation_budgets():
    """Return (block_bytes, vmem_limit_bytes) for the current TPU generation.

    Total buffered footprint is ~4x block (input + output, double-buffered),
    so keep 4*block comfortably under the scoped limit, and the limit under
    physical VMEM (64 MiB on v7x, 128 MiB on v5e/v6e).
    """
    kind = ""
    try:
        kind = jax.devices()[0].device_kind.lower()
    except Exception:
        pass
    if "v7" in kind:
        return 6 * 1024 * 1024, 36 * 1024 * 1024   # 64 MiB physical VMEM: stay modest
    if "v6" in kind:
        return 8 * 1024 * 1024, 64 * 1024 * 1024   # 128 MiB physical: plenty of headroom
    return 4 * 1024 * 1024, 32 * 1024 * 1024       # v5e / unknown: HBM-bound anyway


def _scaling_kernel(x_ref, o_ref, *, rows_per_block, num_channels):
    # x_ref / o_ref: VMEM (br, bl).  Row r of this block is global row
    # i*br + r whose channel is (global row) % C; shift and 1/scale are
    # selected in-kernel from literals (VPU selects are free here).
    i = pl.program_id(0)
    row = jax.lax.broadcasted_iota(jnp.int32, (rows_per_block, 1), 0) + i * rows_per_block
    c = row % num_channels
    shift = jnp.where(c == 0, jnp.float32(_SHIFT[0]),
                      jnp.where(c == 1, jnp.float32(_SHIFT[1]), jnp.float32(_SHIFT[2])))
    inv_scale = jnp.where(c == 0, jnp.float32(_INV_SCALE[0]),
                          jnp.where(c == 1, jnp.float32(_INV_SCALE[1]), jnp.float32(_INV_SCALE[2])))
    xf = x_ref[...].astype(jnp.float32)   # compute in f32, cast back at the store
    o_ref[...] = ((xf - shift) * inv_scale).astype(o_ref.dtype)


def scaling_layer(x: jax.Array) -> jax.Array:
    """Pallas equivalent of ScalingLayer.forward: (x - shift) / scale.

    x: (N, C=3, H, W), NCHW (same layout as PyTorch).
    """
    N, C, H, W = x.shape
    assert C == len(_SHIFT), "ScalingLayer expects 3 channels"

    R = N * C
    L = H * W
    itemsize = jnp.dtype(x.dtype).itemsize
    # Native sublane packing: 8 rows for 32-bit, 16 for 16-bit, 32 for 8-bit dtypes.
    sublane = {4: 8, 2: 16, 1: 32}.get(itemsize, 8)

    block_bytes, vmem_limit = _generation_budgets()

    # Free reshape (NCHW is row-major contiguous): rows are (n, c) planes,
    # the lane (last) dim is the whole spatial plane -> dense, unmasked stores.
    x2 = x.reshape(R, L)

    # ---- Tile sizing: budget is br * bl * itemsize <= block_bytes ----
    br = R if R <= sublane else sublane
    max_bl = max(128, ((block_bytes // (br * itemsize)) // 128) * 128)
    bl = L if L <= max_bl else max_bl

    # Lane axis fully resident with budget to spare: grow rows in sublane multiples.
    if bl == L and R > sublane:
        rows_fit = max(sublane, ((block_bytes // (bl * itemsize)) // sublane) * sublane)
        br = R if R <= rows_fit else rows_fit

    # Guarantee a few grid steps so the pipeline can overlap DMA/compute and
    # v7x can shard across both TensorCores; split the lane axis only (it stays
    # a multiple of 128, so stores remain lane-dense).
    MIN_STEPS = 4
    while pl.cdiv(R, br) * pl.cdiv(L, bl) < MIN_STEPS and bl > 128:
        bl = max(128, ((bl // 2) // 128) * 128)

    grid = (pl.cdiv(R, br), pl.cdiv(L, bl))

    kernel = functools.partial(_scaling_kernel, rows_per_block=br, num_channels=C)

    out2 = pl.pallas_call(
        kernel,
        out_shape=jax.ShapeDtypeStruct((R, L), x.dtype),
        grid_spec=pltpu.PrefetchScalarGridSpec(
            num_scalar_prefetch=0,
            grid=grid,
            in_specs=[pl.BlockSpec((br, bl), lambda i, j: (i, j))],
            out_specs=pl.BlockSpec((br, bl), lambda i, j: (i, j)),
        ),
        compiler_params=pltpu.CompilerParams(
            dimension_semantics=("parallel", "parallel"),
            vmem_limit_bytes=vmem_limit,
        ),
    )(x2)

    return out2.reshape(N, C, H, W)


if __name__ == "__main__":
    key = jax.random.PRNGKey(0)
    x = jax.random.normal(key, (2, 3, 16, 16), dtype=jnp.float32)

    out = jax.block_until_ready(scaling_layer(x))

    # Reference check (plain JAX, same broadcasting as the PyTorch module).
    shift = jnp.array(_SHIFT, dtype=jnp.float32)[None, :, None, None]
    scale = jnp.array(_SCALE, dtype=jnp.float32)[None, :, None, None]
    ref = (x - shift) / scale

    assert out.shape == x.shape and out.dtype == x.dtype
    assert jnp.allclose(out, ref, atol=2e-6, rtol=1e-5)

    print("KERNEL_OK")
</pallas_src>

<mosaic_0001>
module attributes {stable_mosaic.version = 11 : i64} {
  func.func @_scaling_kernel(%arg0: i32, %arg1: i32, %arg2: memref<6x128xf32, #tpu.memory_space<vmem>>, %arg3: memref<6x128xf32, #tpu.memory_space<vmem>>) attributes {dimension_semantics = [#tpu.dimension_semantics<parallel>, #tpu.dimension_semantics<parallel>], iteration_bounds = array<i64: 1, 2>, scalar_prefetch = 0 : i64, scratch_operands = 0 : i64, tpu.core_type = #tpu.core_type<tc>, window_params = [{transform_indices = @transform_0, window_bounds = array<i64: 6, 128>}, {transform_indices = @transform_1, window_bounds = array<i64: 6, 128>}]} {
    %0 = tpu.iota {dimensions = array<i32: 0>} : vector<6x1xi32>
    %c6_i32 = arith.constant 6 : i32
    %1 = arith.muli %arg0, %c6_i32 : i32
    %2 = vector.broadcast %1 : i32 to vector<6x1xi32>
    %3 = arith.addi %0, %2 : vector<6x1xi32>
    %c3_i32 = arith.constant 3 : i32
    %c0_i32 = arith.constant 0 : i32
    %4 = arith.cmpi eq, %c3_i32, %c0_i32 : i32
    %c1_i32 = arith.constant 1 : i32
    %5 = arith.select %4, %c1_i32, %c3_i32 : i32
    %6 = vector.broadcast %5 : i32 to vector<6x1xi32>
    %7 = arith.remsi %3, %6 : vector<6x1xi32>
    %c0_i32_0 = arith.constant 0 : i32
    %8 = vector.broadcast %c0_i32_0 : i32 to vector<6x1xi32>
    %9 = arith.cmpi ne, %7, %8 : vector<6x1xi32>
    %c0_i32_1 = arith.constant 0 : i32
    %10 = vector.broadcast %c0_i32_1 : i32 to vector<6x1xi32>
    %11 = arith.cmpi slt, %7, %10 : vector<6x1xi32>
    %c0_i32_2 = arith.constant 0 : i32
    %12 = arith.cmpi slt, %5, %c0_i32_2 : i32
    %13 = vector.broadcast %12 : i1 to vector<6x1xi1>
    %14 = vector.broadcast %13 : vector<6x1xi1> to vector<6x1xi1>
    %15 = arith.xori %11, %14 : vector<6x1xi1>
    %16 = arith.andi %15, %9 : vector<6x1xi1>
    %17 = vector.broadcast %5 : i32 to vector<6x1xi32>
    %18 = arith.addi %7, %17 : vector<6x1xi32>
    %19 = arith.select %16, %18, %7 : vector<6x1xi1>, vector<6x1xi32>
    %c0_i32_3 = arith.constant 0 : i32
    %20 = vector.broadcast %c0_i32_3 : i32 to vector<6x1xi32>
    %21 = arith.cmpi eq, %19, %20 : vector<6x1xi32>
    %c1_i32_4 = arith.constant 1 : i32
    %22 = vector.broadcast %c1_i32_4 : i32 to vector<6x1xi32>
    %23 = arith.cmpi eq, %19, %22 : vector<6x1xi32>
    %cst = arith.constant -0.0879999995 : f32
    %cst_5 = arith.constant -1.880000e-01 : f32
    %24 = vector.broadcast %cst : f32 to vector<6x1xf32>
    %25 = vector.broadcast %cst_5 : f32 to vector<6x1xf32>
    %26 = arith.select %23, %24, %25 : vector<6x1xi1>, vector<6x1xf32>
    %cst_6 = arith.constant -3.000000e-02 : f32
    %27 = vector.broadcast %cst_6 : f32 to vector<6x1xf32>
    %28 = arith.select %21, %27, %26 : vector<6x1xi1>, vector<6x1xf32>
    %c0_i32_7 = arith.constant 0 : i32
    %29 = vector.broadcast %c0_i32_7 : i32 to vector<6x1xi32>
    %30 = arith.cmpi eq, %19, %29 : vector<6x1xi32>
    %c1_i32_8 = arith.constant 1 : i32
    %31 = vector.broadcast %c1_i32_8 : i32 to vector<6x1xi32>
    %32 = arith.cmpi eq, %19, %31 : vector<6x1xi32>
    %cst_9 = arith.constant 2.23214293 : f32
    %cst_10 = arith.constant 2.22222233 : f32
    %33 = vector.broadcast %cst_9 : f32 to vector<6x1xf32>
    %34 = vector.broadcast %cst_10 : f32 to vector<6x1xf32>
    %35 = arith.select %32, %33, %34 : vector<6x1xi1>, vector<6x1xf32>
    %cst_11 = arith.constant 2.18340611 : f32
    %36 = vector.broadcast %cst_11 : f32 to vector<6x1xf32>
    %37 = arith.select %30, %36, %35 : vector<6x1xi1>, vector<6x1xf32>
    %c0 = arith.constant 0 : index
    %c0_12 = arith.constant 0 : index
    %38 = vector.load %arg2[%c0, %c0_12] : memref<6x128xf32, #tpu.memory_space<vmem>>, vector<6x128xf32>
    %39 = vector.broadcast %28 : vector<6x1xf32> to vector<6x128xf32>
    %40 = arith.subf %38, %39 : vector<6x128xf32>
    %41 = vector.broadcast %37 : vector<6x1xf32> to vector<6x128xf32>
    %42 = arith.mulf %40, %41 : vector<6x128xf32>
    %c0_13 = arith.constant 0 : index
    %c0_14 = arith.constant 0 : index
    %43 = vector.load %arg3[%c0_13, %c0_14] : memref<6x128xf32, #tpu.memory_space<vmem>>, vector<6x128xf32>
    tpu.vector_store %arg3[%c0_13, %c0_14], %42 {strides = array<i32>} : memref<6x128xf32, #tpu.memory_space<vmem>>, vector<6x128xf32>,
    return
  }
  func.func @transform_0(%arg0: i32, %arg1: i32) -> (i32, i32) {
    %c0_i32 = arith.constant 0 : i32
    return %arg0, %arg1 : i32, i32
  }
  func.func @transform_1(%arg0: i32, %arg1: i32) -> (i32, i32) {
    %c0_i32 = arith.constant 0 : i32
    return %arg0, %arg1 : i32, i32
  }
}

</mosaic_0001>

<bundles_post_ra>
// kernel: tpu_custom_call.1
= control target key start
LH: loop header
LB: loop body
LE: loop exit
PB: predicated region body
PF: predicated region fallthrough
CT: control target
= control target key end

     0   :  { %6 = vsyncpa [#allocation3], 0  ;;  %s620_s0 = inlined_call_operand.hbm [shape: f32[6,256], index: 0, kind: input, shape index: {}]   ;;  %s621_s1 = inlined_call_operand.hbm [shape: f32[6,256], index: 1, kind: output, shape index: {}]  }
   0x1   :  { %8 = vsyncpa [#allocation3 + $0x1], 0 }
   0x2   :  { %9 = vsyncpa [#allocation4], 0 }
   0x3   :  { %11 = vsyncpa [#allocation4 + $0x1], 0  ;;  %s482_s6 = smov 0   ;;  %s484_s7 = smov 0  }
   0x4   :  { %s486_s8 = smov 0   ;;  %s488_s9 = smov 0  }
   0x5   :  { %s490_s10 = smov 0   ;;  %s492_s11 = smov 0  }
   0x6 LB: > { %s279_s12 = sadd.s32 4294967295, %s466_s11   ;;  %s280_s13 = sadd.s32 4294967294, %s466_s11   ;;  %s466_s11 = sphi %s492_s11, %s17_s11   ;;  %s462_s10 = sphi %s490_s10, %s633_s10   ;;  %s458_s9 = sphi %s488_s9, %s632_s9   ;;  %s454_s8 = sphi %s486_s8, %s631_s8   ;;  %s450_s7 = sphi %s484_s7, %s630_s7   ;;  %s446_s6 = sphi %s482_s6, %s629_s6  }
   0x7   : > { %s26_s14 = sadd.s32 1, %s462_s10  ;;  %s38_s15 = sadd.s32 1, %s454_s8 }
   0x8   : > { %p27_p0 = scmp.ge.s32.totalorder %s26_s14, 2  ;;  %p45_p1 = scmp.ne.s32.totalorder %s454_s8, %s450_s7 }
   0x9   : > { %p46_p2 = scmp.eq.s32.totalorder %s466_s11, 0  ;;  %p51_p3 = scmp.ne.s32.totalorder %s450_s7, %s446_s6 }
   0xa   : > { %s635_s14 = smov (%p27_p0, %s26_s14), 0  ;;  %p52_p5 = scmp.eq.s32.totalorder %s279_s12, 0 }
   0xb   : > { %p523_p4 = por %p46_p2, %p45_p1  ;;  %s34_s17 = ssub.s32 %s462_s10, %s635_s14 }
   0xc   : > { %p77_p6 = scmp.eq.s32.totalorder %s279_s12, 1  ;;  %p36_p7 = scmp.eq.s32.totalorder %s34_s17, 0 }
   0xd   : > { %p529_p8 = por %p52_p5, %p51_p3  ;;  %p83_p10 = scmp.eq.s32.totalorder %s280_s13, 1 }
   0xe   : > { %p533_p9 = por %p77_p6, %p45_p1  ;;  %p306_p13 = scmp.lt.s32.totalorder %s466_s11, 2 }
   0xf   : > { %s538_s20 = scalar_select %p36_p7, %s454_s8, %s38_s15  }
  0x10   : > { %p540_p11 = por %p83_p10, %p51_p3  ;;  %s103_s22 = sand.u32 1, %s454_s8  }
  0x11   : > { %s283_s23 = sshll.u32 %s103_s22, 3  ;;  %s284_s24 = sshll.u32 %s462_s10, 7 }
  0x12   : > { %s625_s21 = scalar_select %p540_p11, 1, 0 }
  0x13   : > { %s114_s27 = scalar_lea.hbm %s620_s0, %s284_s24  ;;  %s107_s28 = scalar_lea.vmem [#allocation2], %s283_s23 }
  0x14   : > { %s116_s29 = sshll.u32 %s107_s28, 4  ;;  %p553_p0 = pnand %p306_p13, %p523_p4  ;;  %s117_s29 = int_to_ptr.vmem [resolvable:$true] %s116_s29 }
  0x15   : > { %p285_p1 = scmp.ge.s32.totalorder %s466_s11, 1  ;;  %p121_p2 = scmp.lt.s32.totalorder %s466_s11, 3 }
  0x16   : > { %s104_s2 = scalar_lea.sflag [#allocation3], %s103_s22  ;;  %p360_p3 = pneg %p553_p0 }
  0x17   : > { %s371_s3 = scalar_lea.vmem %s117_s29, 128  ;;  %s468_s4 = smov [#allocation2]  }
  0x18   : > { %p372_p5 = scmp.ne.s32.totalorder %s117_s29, %s371_s3  ;;  %s376_s5 = sshll.u32 %s468_s4, 4  ;;  %s377_s5 = int_to_ptr.vmem [resolvable:$false] %s376_s5 }
  0x19   : > { %s378_s12 = scalar_lea.vmem %s377_s5, 256  ;;  %p379_p10 = scmp.lt.s32.totalorder %s117_s29, %s377_s5 }
  0x1a   : > { %p374_p6 = pnand %p372_p5, %p360_p3  ;;  %p380_p12 = scmp.lt.s32.totalorder %s378_s12, %s371_s3 }
  0x1c   : > { %p375_p7 = pneg %p374_p6  ;;  %p381_p4 = por %p380_p12, %p379_p10 }
  0x1e   : > { %p382_p13 = pnand %p381_p4, %p375_p7 }
  0x20   : > { %385 = shalt.err (!%p382_p13)
}
  0x21   : > { %301 = dma.hbm_to_vmem [thread:$0]  (!%p553_p0), %s114_s27, 128, %s117_s29, %s104_s2  }
  0x22   : > { %p122_p11 = pnand %p285_p1, %p121_p2 }
  0x23   : > { %s568_s13 = sand.u32 (!%p122_p11), 1, %s450_s7  }
  0x24   : > { %125 = sbr.rel (%p122_p11) target bundleno = 77 (0x4d), region = 24  ;;  %s286_s15 = sshll.u32 (!%p122_p11), %s568_s13, 3 }
  0x25   : > { %s128_s16 = scalar_lea.sflag (!%p122_p11), [#allocation3], %s568_s13  ;;  %s131_s17 = scalar_lea.vmem (!%p122_p11), [#allocation2], %s286_s15 }
  0x29   : > { %437 = dma.done.wait (%p529_p8), %s128_s16, 128  }
  0x2a   : > { %439 = vsyncadd (%p529_p8), %s128_s16, 4294967168  ;;  %v150_v0 = vlaneseq  ;;  %v177_v9 = vld [vmem:[%s131_s17] sm:$0x3f]  ;;  %v469_v10 = vmov -0.188   ;;  %s149_s18 = scalar_lea.vmem [#allocation5], %s286_s15 }
  0x2b   : > { %v470_v12 = vmov 2.2222223   ;;  %s197_s22 = sshll.u32 %s149_s18, 4  ;;  %s289_s23 = sshll.u32 %s458_s9, 7  ;;  %s198_s22 = int_to_ptr.vmem [resolvable:$true] %s197_s22 }
  0x2c   : > { %v151_v1 = vshrl.u32 %v150_v0, 7  ;;  %s195_s26 = scalar_lea.hbm %s621_s1, %s289_s23  ;;  %s182_s27 = scalar_lea.sflag [#allocation4], %s568_s13 }
  0x2d   : > { %s386_s28 = scalar_lea.vmem %s198_s22, 128  ;;  %s471_s29 = smov [#allocation5]  }
  0x2e   : > { %v576_v2 = vmul.u32.u64.low 2863311531, %v151_v1  ;;  %v577_v3 = vmul.u32.u64.high 2863311531, %v151_v1, %v576_v2  ;;  %p387_p8 = scmp.ne.s32.totalorder %s198_s22, %s386_s28  ;;  %s390_s30 = sshll.u32 %s471_s29, 4  ;;  %s391_s30 = int_to_ptr.vmem [resolvable:$false] %s390_s30 }
  0x2f   : > { %s392_s2 = scalar_lea.vmem %s391_s30, 256  ;;  %p393_p0 = scmp.lt.s32.totalorder %s198_s22, %s391_s30 }
  0x30   : > { %v161_v4 = vshrl.u32 %v577_v3, 1  ;;  %p388_p11 = pnand %p387_p8, %p533_p9  ;;  %p394_p1 = scmp.lt.s32.totalorder %s392_s2, %s386_s28 }
  0x32   : > { %v162_v5 = vmul.u32 3, %v161_v4  ;;  %p389_p12 = pneg %p388_p11  ;;  %p395_p2 = por %p394_p1, %p393_p0 }
  0x34   : > { %v163_v6 = vsub.s32 %v151_v1, %v162_v5  ;;  %p396_p3 = pnand %p395_p2, %p389_p12 }
  0x36   : > { %vm166_vm0 = vcmp.ne.s32.totalorder %v163_v6, 0  ;;  %vm167_vm1 = vcmp.lt.s32.totalorder %v163_v6, 0  ;;  %v169_v7 = vadd.s32 3, %v163_v6 }
  0x37   : > { %vm168_vm2 = vmand %vm167_vm1, %vm166_vm0 }
  0x38   : > { %v170_v8 = vsel %vm168_vm2, %v169_v7, %v163_v6 }
  0x39   : > { %vm171_vm3 = vcmp.eq.s32.totalorder %v170_v8, 0  ;;  %vm172_vm4 = vcmp.eq.s32.totalorder %v170_v8, 1 }
  0x3a   : > { %v173_v11 = vsel %vm172_vm4, -0.088, %v469_v10  ;;  %v175_v13 = vsel %vm172_vm4, 2.232143, %v470_v12 }
  0x3b   : > { %v174_v14 = vsel %vm171_vm3, -0.03, %v173_v11  ;;  %v176_v15 = vsel %vm171_vm3, 2.183406, %v175_v13 }
  0x3c   : > { %v178_v16 = vsub.f32 %v177_v9, %v174_v14 }
  0x3e   : > { %v179_v17 = vmul.f32 %v178_v16, %v176_v15 }
  0x40   : > { %180 = vst [vmem:[%s149_s18] sm:$0x3f] %v179_v17 }
  0x41   : > { %399 = shalt.err (!%p396_p3)
}
  0x42   : > { %s400_s9 = scalar_lea.hbm %s195_s26, 128  ;;  %s404_s5 = scalar_lea.hbm %s621_s1, 256 }
  0x43   : > { %p401_p5 = scmp.ne.s32.totalorder %s195_s26, %s400_s9  ;;  %p405_p10 = scmp.lt.s32.totalorder %s195_s26, %s621_s1 }
  0x44   : > { %p406_p4 = scmp.lt.s32.totalorder %s404_s5, %s400_s9 }
  0x45   : > { %p402_p6 = pnand %p401_p5, %p533_p9 }
  0x46   : > { %p407_p13 = por %p406_p4, %p405_p10 }
  0x47   : > { %p403_p7 = pneg %p402_p6 }
  0x49   : > { %p408_p8 = pnand %p407_p13, %p403_p7 }
  0x4b   : > { %411 = shalt.err (!%p408_p8)
}
  0x4c   : > { %296 = dma.vmem_to_hbm [thread:$0]  (%p533_p9), %s198_s22, 128, %s195_s26, %s182_s27  }
  0x4d PF: > { %s209_s15 = sand.u32 1, %s446_s6   ;;  %p627_p11 = scmp.ne.s32.totalorder %s625_s21, 0 }
  0x4e   : > { %p628_p12 = scmp.ge.s32.totalorder %s466_s11, 2  ;;  %s210_s16 = scalar_lea.sflag [#allocation4], %s209_s15 }
  0x50   : > { %p303_p0 = pnand %p628_p12, %p627_p11 }
  0x52   : > { %p304_p1 = pneg %p303_p0 }
  0x54   : > { %441 = dma.done.wait (%p304_p1), %s210_s16, 128  }
  0x55   : > { %443 = vsyncadd (%p304_p1), %s210_s16, 4294967168  ;;  %s17_s11 = sadd.s32 1, %s466_s11   ;;  %s629_s6 = smov %s450_s7 }
  0x56   : > { %p14_p2 = scmp.ge.s32.totalorder %s17_s11, 4   ;;  %s630_s7 = smov %s454_s8 }
  0x57   : > { %s631_s8 = smov %s538_s20  ;;  %s632_s9 = smov %s462_s10 }
  0x58   : > { %s633_s10 = smov %s635_s14  ;;  %16 = sbr.rel (!%p14_p2) target bundleno = 6 (0x6), region = 69 }
  0x5d   :  { %215 = vsyncpa [#allocation3], 1 }
  0x5e   :  { %217 = vsyncpa [#allocation3 + $0x1], 1 }
  0x5f   :  { %218 = vsyncpa [#allocation4], 1 }
  0x60   :  { %220 = vsyncpa [#allocation4 + $0x1], 1 }

</bundles_post_ra>
